<compile_context>
chip_gen: v5e
topology: v5e:2x2
jax: 0.10.0
libtpu: 0.0.40
codegen_flags: <defaults>
</compile_context>

<pallas_src>
import jax
import jax.numpy as jnp
from jax.experimental import pallas as pl
from jax.experimental.pallas import tpu as pltpu

# ---------------- small synthetic config ----------------
B = 2             # batch
S = 4             # frames           (original BDD-X uses 32 -> hard-coded "31")
C = 3             # channels
H = W = 32        # spatial
PT, PS = 2, 8     # temporal / spatial patch of the swin stub
SP, HP, WP = S // PT, H // PS, W // PS
M = SP * HP * WP                # video tokens  (= args.max_img_seq_length)
LATENT = 64                     # latent_feat_size (swin.backbone.norm dim)
IMG_FEAT_DIM = 128              # args.img_feature_dim
L = M                           # max_img_seq_length
T_TXT = 8                       # text tokens
T_TOT = T_TXT + L
VOCAB = 50
PATCH_DIM = C * PT * PS * PS    # 384 (lane-aligned: 3 * 128)

N_TOK = B * M                   # token rows fed to the fused kernel
# Row tile: largest that fits; >=256 is the target on v6e/v7x at BDD-X sizes,
# kept a multiple of 16 (bf16 sublane packing; 8 would suffice for f32 LN).
TILE_N_MAX = 256


# ---------------- fused token kernel (swin stub -> LN -> fc) ----------------
def _video_token_kernel(patches_ref, flow_ref,
                        swin_w_ref, swin_b_ref, gamma_ref, beta_ref,
                        fc_w_ref, fc_wf_ref, fc_b_ref,
                        tok_ref):
    # swin stub: bf16 patch-embed matmul (MXU), f32 accumulation
    y = jnp.dot(patches_ref[...], swin_w_ref[...],
                preferred_element_type=jnp.float32)              # (TILE_N, LATENT)
    y = y + swin_b_ref[...]

    # single-pass LayerNorm (biased var, like torch LN): var = E[x^2] - mean^2
    mu = jnp.mean(y, axis=-1, keepdims=True)
    ex2 = jnp.mean(y * y, axis=-1, keepdims=True)
    var = ex2 - mu * mu
    hn = (y - mu) * jax.lax.rsqrt(var + 1e-5) * gamma_ref[...] + beta_ref[...]

    # self.fc(concat(vid_feats, padded_flow)) == hn @ W_main + flow*w_flow + b
    # (intentional mixed precision: main weight bf16 on MXU, flow/bias in f32)
    z = jnp.dot(hn.astype(jnp.bfloat16), fc_w_ref[...],
                preferred_element_type=jnp.float32)              # (TILE_N, 128)
    z = z + flow_ref[...] * fc_wf_ref[...] + fc_b_ref[...]
    tok_ref[...] = z.astype(tok_ref.dtype)                       # bf16 lane-dense store


def fused_video_tokens(patches_bf16, flow_rows, params):
    n_tok = patches_bf16.shape[0]
    tile_n = min(TILE_N_MAX, n_tok)
    assert tile_n % 8 == 0
    grid = (pl.cdiv(n_tok, tile_n),)   # cdiv + masked tail store: no dropped rows

    def inv(shape):  # grid-invariant weight block
        # NOTE(prod): mark these pipeline_mode=pl.Buffered(1) when scaling
        # TILE_N / real swin weights so v7x's 64 MiB VMEM isn't spent
        # double-buffering invariant operands.
        return pl.BlockSpec(shape, lambda i: (0, 0))

    tokens = pl.pallas_call(
        _video_token_kernel,
        out_shape=jax.ShapeDtypeStruct((n_tok, IMG_FEAT_DIM), jnp.bfloat16),
        grid=grid,
        in_specs=[
            pl.BlockSpec((tile_n, PATCH_DIM), lambda i: (i, 0)),   # patches (bf16)
            pl.BlockSpec((tile_n, 1), lambda i: (i, 0)),           # per-row flow (f32)
            inv((PATCH_DIM, LATENT)),                              # swin_w (bf16)
            inv((1, LATENT)),                                      # swin_b
            inv((1, LATENT)),                                      # LN gamma
            inv((1, LATENT)),                                      # LN beta
            inv((LATENT, IMG_FEAT_DIM)),                           # fc_w_main (bf16)
            inv((1, IMG_FEAT_DIM)),                                # fc_w_flow
            inv((1, IMG_FEAT_DIM)),                                # fc_b
        ],
        out_specs=pl.BlockSpec((tile_n, IMG_FEAT_DIM), lambda i: (i, 0)),
        compiler_params=pltpu.CompilerParams(
            dimension_semantics=("parallel",),       # rows shard cleanly over v7x's 2 TCs
            vmem_limit_bytes=32 * 1024 * 1024),      # above v5e's 16 MiB scoped default;
                                                     # re-sweep per chip at BDD-X sizes
    )(patches_bf16, flow_rows,
      params['swin_w'], params['swin_b'], params['swin_gamma'], params['swin_beta'],
      params['fc_w_main'], params['fc_w_flow'], params['fc_b'])
    return tokens


# ---------------- tiny learned-mask + sparsity kernel (single step) ----------------
def _learned_mask_kernel(learn_w_ref, att_ref, sp_ref):
    Lv = att_ref.shape[0]
    sig = jax.nn.sigmoid(learn_w_ref[...].astype(jnp.float32))   # EUP
    rows = jax.lax.broadcasted_iota(jnp.int32, (Lv, Lv), 0)
    cols = jax.lax.broadcasted_iota(jnp.int32, (Lv, Lv), 1)
    is_diag = rows == cols
    att_ref[...] = jnp.where(is_diag, 1.0, sig)                  # diag + (1-diag)*sig
    off = jnp.where(is_diag, 0.0, sig)                           # video_attention >= 0
    s = jnp.sum(off, axis=1, keepdims=True)                      # (Lv, 1)
    s = jnp.sum(s, axis=0, keepdims=True)                        # (1, 1)
    sp_ref[...] = s * (1.0 / float(Lv * Lv))                     # mean(|video_attention|)


def learned_mask_head(learn_att_w):
    att, sp = pl.pallas_call(
        _learned_mask_kernel,
        out_shape=(jax.ShapeDtypeStruct((L, L), jnp.float32),
                   jax.ShapeDtypeStruct((1, 1), jnp.float32)),
        grid=(1,),
        in_specs=[pl.BlockSpec((L, L), lambda i: (0, 0))],
        out_specs=(pl.BlockSpec((L, L), lambda i: (0, 0)),
                   pl.BlockSpec((1, 1), lambda i: (0, 0))),
        compiler_params=pltpu.CompilerParams(
            dimension_semantics=("arbitrary",)),
    )(learn_att_w)
    return att, sp


# ---------------- stubs for injected external modules ----------------
def trans_encoder_stub(params, input_ids, attention_mask, token_type_ids, img_feats):
    # External BERT-style encoder injected into VideoTransformer.__init__;
    # replaced by a deterministic single mixing layer (plain-JAX glue).
    emb = params['tok_emb'][input_ids] + params['type_emb'][token_type_ids]   # (B,T,F)
    feats = jnp.concatenate([emb, img_feats.astype(emb.dtype)], axis=1)       # (B,Ttot,F)
    att = attention_mask / (jnp.sum(attention_mask, axis=-1, keepdims=True) + 1e-6)
    h = jnp.einsum('bij,bjf->bif', att, feats)
    logits = h @ params['w_out'] + params['b_out']                            # (B,Ttot,V)
    return (logits,)


# ---------------- VideoTransformer.forward ----------------
def video_transformer_forward(params, input_ids, attention_mask,
                              token_type_ids, img_feats):
    Bv, Sv, Cv, Hv, Wv = img_feats.shape
    # images = images.permute(0, 2, 1, 3, 4)  -> (B, C, S, H, W)
    images = jnp.transpose(img_feats, (0, 2, 1, 3, 4))

    # compute_optical_flow: cv2 Lucas-Kanade sparse flow has no TPU equivalent;
    # deterministic frame-difference proxy (shape (B, S-1, 1), float32).
    # TODO(synk): cv2.goodFeaturesToTrack / calcOpticalFlowPyrLK not translatable.
    frame_mean = jnp.mean(images, axis=(1, 3, 4))                     # (B, S) in f32
    flow = (frame_mean[:, 1:] - frame_mean[:, :-1])[..., None]        # (B, S-1, 1)

    # swin(images): 3D patchify (token-major, channels-last patches).  Cast to
    # bf16 BEFORE the relayout so the whole-video transpose moves half the
    # bytes; kept in XLA at toy shapes.
    # TODO(synk): at BDD-X sizes fold this patchify into the kernel via a
    # multi-dim BlockSpec index_map / manual strided DMA over (B,C,S,H,W).
    images_bf16 = images.astype(jnp.bfloat16)
    x = images_bf16.reshape(Bv, Cv, SP, PT, HP, PS, WP, PS)
    patches = jnp.transpose(x, (0, 2, 4, 6, 1, 3, 5, 7)).reshape(Bv * M, PATCH_DIM)

    # padded_feats[:, :S-1, :] = optical_flow_feats  (torch hard-codes 31 = S-1:
    # only the first S-1 of M token slots carry flow, the rest stay zero).
    padded = jnp.zeros((Bv, M, 1), jnp.float32)
    padded = padded.at[:, :Sv - 1, :].set(flow.astype(jnp.float32))
    flow_rows = padded.reshape(Bv * M, 1)

    # Fused row-tiled kernel: swin-stub matmul + LN -> fc  (bf16 tokens out).
    tokens = fused_video_tokens(patches, flow_rows, params)
    img_tokens = tokens.reshape(Bv, M, IMG_FEAT_DIM)

    # Learned mask + sparsity: tiny single-step kernel (no per-row-tile recompute,
    # no grid-invariant outputs on the parallel axis).
    learn_att, sparsity = learned_mask_head(params['learn_vid_att'].reshape(L, L))

    # learn_mask_enabled branch: blend learned mask into the vid-vid window.
    attention_mask = attention_mask.astype(jnp.float32)
    attention_mask = attention_mask.at[:, -L:, -L:].set(
        jnp.broadcast_to(learn_att, (attention_mask.shape[0], L, L)))

    outputs = trans_encoder_stub(params, input_ids, attention_mask,
                                 token_type_ids, img_tokens)

    loss_sparsity = sparsity[0, 0]       # get_loss_sparsity(video_attention)
    return outputs + (loss_sparsity,)


# ---------------- deterministic parameter init ----------------
def init_params(key):
    ks = jax.random.split(key, 10)
    def u(k, shape, scale):
        return (jax.random.uniform(k, shape, jnp.float32) - 0.5) * 2.0 * scale
    return {
        # MXU operands stored in bf16 (halves DMA bytes, bf16 MXU path);
        # all bias/LN/sigmoid params stay f32 (VPU/EUP math in f32).
        'swin_w':        u(ks[0], (PATCH_DIM, LATENT), 0.05).astype(jnp.bfloat16),
        'swin_b':        jnp.zeros((1, LATENT), jnp.float32),
        'swin_gamma':    jnp.ones((1, LATENT), jnp.float32),
        'swin_beta':     jnp.zeros((1, LATENT), jnp.float32),
        # torch.nn.Linear(latent+1, img_feature_dim): weight^T split into main / flow row
        'fc_w_main':     u(ks[1], (LATENT, IMG_FEAT_DIM), 0.05).astype(jnp.bfloat16),
        'fc_w_flow':     u(ks[2], (1, IMG_FEAT_DIM), 0.05),
        'fc_b':          u(ks[3], (1, IMG_FEAT_DIM), 0.01),
        # torch.nn.Embedding(L*L, 1)
        'learn_vid_att': u(ks[4], (L * L, 1), 1.0),
        # trans_encoder stub params (external module)
        'tok_emb':       u(ks[5], (VOCAB, IMG_FEAT_DIM), 0.05),
        'type_emb':      u(ks[6], (2, IMG_FEAT_DIM), 0.05),
        'w_out':         u(ks[7], (IMG_FEAT_DIM, VOCAB), 0.05),
        'b_out':         jnp.zeros((VOCAB,), jnp.float32),
    }


if __name__ == "__main__":
    key = jax.random.PRNGKey(0)
    kp, k1, k2, k3 = jax.random.split(key, 4)
    params = init_params(kp)

    img_feats = jax.random.uniform(k1, (B, S, C, H, W), jnp.float32)      # video frames
    input_ids = jax.random.randint(k2, (B, T_TXT), 0, VOCAB)
    token_type_ids = jnp.zeros((B, T_TXT), jnp.int32)
    attention_mask = jnp.ones((B, T_TOT, T_TOT), jnp.float32)

    fwd = jax.jit(video_transformer_forward)
    logits, loss_sparsity = fwd(params, input_ids, attention_mask,
                                token_type_ids, img_feats)
    jax.block_until_ready((logits, loss_sparsity))

    assert logits.shape == (B, T_TOT, VOCAB)
    assert loss_sparsity.shape == ()
    print("KERNEL_OK")
</pallas_src>

<mosaic_0001>
module attributes {stable_mosaic.version = 11 : i64} {
  func.func @_video_token_kernel(%arg0: i32, %arg1: memref<64x384xbf16, #tpu.memory_space<vmem>>, %arg2: memref<64x1xf32, #tpu.memory_space<vmem>>, %arg3: memref<384x64xbf16, #tpu.memory_space<vmem>>, %arg4: memref<1x64xf32, #tpu.memory_space<vmem>>, %arg5: memref<1x64xf32, #tpu.memory_space<vmem>>, %arg6: memref<1x64xf32, #tpu.memory_space<vmem>>, %arg7: memref<64x128xbf16, #tpu.memory_space<vmem>>, %arg8: memref<1x128xf32, #tpu.memory_space<vmem>>, %arg9: memref<1x128xf32, #tpu.memory_space<vmem>>, %arg10: memref<64x128xbf16, #tpu.memory_space<vmem>>) attributes {dimension_semantics = [#tpu.dimension_semantics<parallel>], iteration_bounds = array<i64: 1>, scalar_prefetch = 0 : i64, scratch_operands = 0 : i64, tpu.core_type = #tpu.core_type<tc>, window_params = [{transform_indices = @transform_0, window_bounds = array<i64: 64, 384>}, {transform_indices = @transform_1, window_bounds = array<i64: 64, 1>}, {pipeline_mode = #tpu.pipeline_mode<synchronous>, transform_indices = @transform_2, window_bounds = array<i64: 384, 64>}, {pipeline_mode = #tpu.pipeline_mode<synchronous>, transform_indices = @transform_3, window_bounds = array<i64: 1, 64>}, {pipeline_mode = #tpu.pipeline_mode<synchronous>, transform_indices = @transform_4, window_bounds = array<i64: 1, 64>}, {pipeline_mode = #tpu.pipeline_mode<synchronous>, transform_indices = @transform_5, window_bounds = array<i64: 1, 64>}, {pipeline_mode = #tpu.pipeline_mode<synchronous>, transform_indices = @transform_6, window_bounds = array<i64: 64, 128>}, {pipeline_mode = #tpu.pipeline_mode<synchronous>, transform_indices = @transform_7, window_bounds = array<i64: 1, 128>}, {pipeline_mode = #tpu.pipeline_mode<synchronous>, transform_indices = @transform_8, window_bounds = array<i64: 1, 128>}, {transform_indices = @transform_9, window_bounds = array<i64: 64, 128>}]} {
    %c0 = arith.constant 0 : index
    %c0_0 = arith.constant 0 : index
    %0 = vector.load %arg1[%c0, %c0_0] : memref<64x384xbf16, #tpu.memory_space<vmem>>, vector<64x384xbf16>
    %c0_1 = arith.constant 0 : index
    %c0_2 = arith.constant 0 : index
    %1 = vector.load %arg3[%c0_1, %c0_2] : memref<384x64xbf16, #tpu.memory_space<vmem>>, vector<384x64xbf16>
    %cst = arith.constant dense<0.000000e+00> : vector<64x64xf32>
    %2 = tpu.matmul %0, %1, %cst {dimension_numbers = #tpu.dot_dimension_numbers<[1], [0], [0], [1], [0, 0, 1, 1], [], []>} : vector<64x384xbf16>, vector<384x64xbf16>, vector<64x64xf32> -> vector<64x64xf32>
    %c0_3 = arith.constant 0 : index
    %c0_4 = arith.constant 0 : index
    %3 = vector.load %arg4[%c0_3, %c0_4] : memref<1x64xf32, #tpu.memory_space<vmem>>, vector<1x64xf32>
    %4 = vector.broadcast %3 : vector<1x64xf32> to vector<64x64xf32>
    %5 = arith.addf %2, %4 : vector<64x64xf32>
    %cst_5 = arith.constant dense<0.000000e+00> : vector<64xf32>
    %6 = vector.multi_reduction <add>, %5, %cst_5 [1] : vector<64x64xf32> to vector<64xf32>
    %7 = vector.shape_cast %6 : vector<64xf32> to vector<64x1xf32>
    %cst_6 = arith.constant 6.400000e+01 : f32
    %8 = vector.broadcast %cst_6 : f32 to vector<64x1xf32>
    %9 = arith.divf %7, %8 : vector<64x1xf32>
    %10 = arith.mulf %5, %5 : vector<64x64xf32>
    %cst_7 = arith.constant dense<0.000000e+00> : vector<64xf32>
    %11 = vector.multi_reduction <add>, %10, %cst_7 [1] : vector<64x64xf32> to vector<64xf32>
    %12 = vector.shape_cast %11 : vector<64xf32> to vector<64x1xf32>
    %cst_8 = arith.constant 6.400000e+01 : f32
    %13 = vector.broadcast %cst_8 : f32 to vector<64x1xf32>
    %14 = arith.divf %12, %13 : vector<64x1xf32>
    %15 = arith.mulf %9, %9 : vector<64x1xf32>
    %16 = arith.subf %14, %15 : vector<64x1xf32>
    %17 = vector.broadcast %9 : vector<64x1xf32> to vector<64x64xf32>
    %18 = arith.subf %5, %17 : vector<64x64xf32>
    %cst_9 = arith.constant 9.99999974E-6 : f32
    %19 = vector.broadcast %cst_9 : f32 to vector<64x1xf32>
    %20 = arith.addf %16, %19 : vector<64x1xf32>
    %21 = math.rsqrt %20 : vector<64x1xf32>
    %22 = vector.broadcast %21 : vector<64x1xf32> to vector<64x64xf32>
    %23 = arith.mulf %18, %22 : vector<64x64xf32>
    %c0_10 = arith.constant 0 : index
    %c0_11 = arith.constant 0 : index
    %24 = vector.load %arg5[%c0_10, %c0_11] : memref<1x64xf32, #tpu.memory_space<vmem>>, vector<1x64xf32>
    %25 = vector.broadcast %24 : vector<1x64xf32> to vector<64x64xf32>
    %26 = arith.mulf %23, %25 : vector<64x64xf32>
    %c0_12 = arith.constant 0 : index
    %c0_13 = arith.constant 0 : index
    %27 = vector.load %arg6[%c0_12, %c0_13] : memref<1x64xf32, #tpu.memory_space<vmem>>, vector<1x64xf32>
    %28 = vector.broadcast %27 : vector<1x64xf32> to vector<64x64xf32>
    %29 = arith.addf %26, %28 : vector<64x64xf32>
    %30 = arith.truncf %29 : vector<64x64xf32> to vector<64x64xbf16>
    %c0_14 = arith.constant 0 : index
    %c0_15 = arith.constant 0 : index
    %31 = vector.load %arg7[%c0_14, %c0_15] : memref<64x128xbf16, #tpu.memory_space<vmem>>, vector<64x128xbf16>
    %cst_16 = arith.constant dense<0.000000e+00> : vector<64x128xf32>
    %32 = tpu.matmul %30, %31, %cst_16 {dimension_numbers = #tpu.dot_dimension_numbers<[1], [0], [0], [1], [0, 0, 1, 1], [], []>} : vector<64x64xbf16>, vector<64x128xbf16>, vector<64x128xf32> -> vector<64x128xf32>
    %c0_17 = arith.constant 0 : index
    %c0_18 = arith.constant 0 : index
    %33 = vector.load %arg2[%c0_17, %c0_18] : memref<64x1xf32, #tpu.memory_space<vmem>>, vector<64x1xf32>
    %c0_19 = arith.constant 0 : index
    %c0_20 = arith.constant 0 : index
    %34 = vector.load %arg8[%c0_19, %c0_20] : memref<1x128xf32, #tpu.memory_space<vmem>>, vector<1x128xf32>
    %35 = vector.broadcast %33 : vector<64x1xf32> to vector<64x128xf32>
    %36 = vector.broadcast %34 : vector<1x128xf32> to vector<64x128xf32>
    %37 = arith.mulf %35, %36 : vector<64x128xf32>
    %38 = arith.addf %32, %37 : vector<64x128xf32>
    %c0_21 = arith.constant 0 : index
    %c0_22 = arith.constant 0 : index
    %39 = vector.load %arg9[%c0_21, %c0_22] : memref<1x128xf32, #tpu.memory_space<vmem>>, vector<1x128xf32>
    %40 = vector.broadcast %39 : vector<1x128xf32> to vector<64x128xf32>
    %41 = arith.addf %38, %40 : vector<64x128xf32>
    %42 = arith.truncf %41 : vector<64x128xf32> to vector<64x128xbf16>
    %c0_23 = arith.constant 0 : index
    %c0_24 = arith.constant 0 : index
    %43 = vector.load %arg10[%c0_23, %c0_24] : memref<64x128xbf16, #tpu.memory_space<vmem>>, vector<64x128xbf16>
    tpu.vector_store %arg10[%c0_23, %c0_24], %42 {strides = array<i32>} : memref<64x128xbf16, #tpu.memory_space<vmem>>, vector<64x128xbf16>,
    return
  }
  func.func @transform_0(%arg0: i32) -> (i32, i32) {
    %c0_i32 = arith.constant 0 : i32
    %c0_i32_0 = arith.constant 0 : i32
    return %arg0, %c0_i32 : i32, i32
  }
  func.func @transform_1(%arg0: i32) -> (i32, i32) {
    %c0_i32 = arith.constant 0 : i32
    %c0_i32_0 = arith.constant 0 : i32
    return %arg0, %c0_i32 : i32, i32
  }
  func.func @transform_2(%arg0: i32) -> (i32, i32) {
    %c0_i32 = arith.constant 0 : i32
    %c0_i32_0 = arith.constant 0 : i32
    %c0_i32_1 = arith.constant 0 : i32
    return %c0_i32, %c0_i32_0 : i32, i32
  }
  func.func @transform_3(%arg0: i32) -> (i32, i32) {
    %c0_i32 = arith.constant 0 : i32
    %c0_i32_0 = arith.constant 0 : i32
    %c0_i32_1 = arith.constant 0 : i32
    return %c0_i32, %c0_i32_0 : i32, i32
  }
  func.func @transform_4(%arg0: i32) -> (i32, i32) {
    %c0_i32 = arith.constant 0 : i32
    %c0_i32_0 = arith.constant 0 : i32
    %c0_i32_1 = arith.constant 0 : i32
    return %c0_i32, %c0_i32_0 : i32, i32
  }
  func.func @transform_5(%arg0: i32) -> (i32, i32) {
    %c0_i32 = arith.constant 0 : i32
    %c0_i32_0 = arith.constant 0 : i32
    %c0_i32_1 = arith.constant 0 : i32
    return %c0_i32, %c0_i32_0 : i32, i32
  }
  func.func @transform_6(%arg0: i32) -> (i32, i32) {
    %c0_i32 = arith.constant 0 : i32
    %c0_i32_0 = arith.constant 0 : i32
    %c0_i32_1 = arith.constant 0 : i32
    return %c0_i32, %c0_i32_0 : i32, i32
  }
  func.func @transform_7(%arg0: i32) -> (i32, i32) {
    %c0_i32 = arith.constant 0 : i32
    %c0_i32_0 = arith.constant 0 : i32
    %c0_i32_1 = arith.constant 0 : i32
    return %c0_i32, %c0_i32_0 : i32, i32
  }
  func.func @transform_8(%arg0: i32) -> (i32, i32) {
    %c0_i32 = arith.constant 0 : i32
    %c0_i32_0 = arith.constant 0 : i32
    %c0_i32_1 = arith.constant 0 : i32
    return %c0_i32, %c0_i32_0 : i32, i32
  }
  func.func @transform_9(%arg0: i32) -> (i32, i32) {
    %c0_i32 = arith.constant 0 : i32
    %c0_i32_0 = arith.constant 0 : i32
    return %arg0, %c0_i32 : i32, i32
  }
}

module attributes {stable_mosaic.version = 11 : i64} {
  func.func @_learned_mask_kernel(%arg0: i32, %arg1: memref<32x32xf32, #tpu.memory_space<vmem>>, %arg2: memref<32x32xf32, #tpu.memory_space<vmem>>, %arg3: memref<1x1xf32, #tpu.memory_space<vmem>>) attributes {dimension_semantics = [#tpu.dimension_semantics<arbitrary>], iteration_bounds = array<i64: 1>, scalar_prefetch = 0 : i64, scratch_operands = 0 : i64, tpu.core_type = #tpu.core_type<tc>, window_params = [{pipeline_mode = #tpu.pipeline_mode<synchronous>, transform_indices = @transform_0, window_bounds = array<i64: 32, 32>}, {pipeline_mode = #tpu.pipeline_mode<synchronous>, transform_indices = @transform_1, window_bounds = array<i64: 32, 32>}, {pipeline_mode = #tpu.pipeline_mode<synchronous>, transform_indices = @transform_2, window_bounds = array<i64: 1, 1>}]} {
    %c0 = arith.constant 0 : index
    %c0_0 = arith.constant 0 : index
    %0 = vector.load %arg1[%c0, %c0_0] : memref<32x32xf32, #tpu.memory_space<vmem>>, vector<32x32xf32>
    %1 = arith.negf %0 : vector<32x32xf32>
    %2 = math.exp %1 : vector<32x32xf32>
    %cst = arith.constant 1.000000e+00 : f32
    %3 = vector.broadcast %cst : f32 to vector<32x32xf32>
    %4 = arith.addf %3, %2 : vector<32x32xf32>
    %5 = arith.divf %3, %4 : vector<32x32xf32>
    %6 = tpu.iota {dimensions = array<i32: 0>} : vector<32x32xi32>
    %7 = tpu.iota {dimensions = array<i32: 1>} : vector<32x32xi32>
    %8 = arith.cmpi eq, %6, %7 : vector<32x32xi32>
    %cst_1 = arith.constant 1.000000e+00 : f32
    %9 = vector.broadcast %cst_1 : f32 to vector<32x32xf32>
    %10 = arith.select %8, %9, %5 : vector<32x32xi1>, vector<32x32xf32>
    %c0_2 = arith.constant 0 : index
    %c0_3 = arith.constant 0 : index
    %11 = vector.load %arg2[%c0_2, %c0_3] : memref<32x32xf32, #tpu.memory_space<vmem>>, vector<32x32xf32>
    tpu.vector_store %arg2[%c0_2, %c0_3], %10 {strides = array<i32>} : memref<32x32xf32, #tpu.memory_space<vmem>>, vector<32x32xf32>,
    %cst_4 = arith.constant 0.000000e+00 : f32
    %12 = vector.broadcast %cst_4 : f32 to vector<32x32xf32>
    %13 = arith.select %8, %12, %5 : vector<32x32xi1>, vector<32x32xf32>
    %cst_5 = arith.constant dense<0.000000e+00> : vector<32xf32>
    %14 = vector.multi_reduction <add>, %13, %cst_5 [1] : vector<32x32xf32> to vector<32xf32>
    %15 = vector.shape_cast %14 : vector<32xf32> to vector<32x1xf32>
    %cst_6 = arith.constant dense<0.000000e+00> : vector<1xf32>
    %16 = vector.multi_reduction <add>, %15, %cst_6 [0] : vector<32x1xf32> to vector<1xf32>
    %17 = vector.shape_cast %16 : vector<1xf32> to vector<1x1xf32>
    %cst_7 = arith.constant 9.765625E-4 : f32
    %18 = vector.broadcast %cst_7 : f32 to vector<1x1xf32>
    %19 = arith.mulf %17, %18 : vector<1x1xf32>
    %c0_8 = arith.constant 0 : index
    %c0_9 = arith.constant 0 : index
    %20 = vector.load %arg3[%c0_8, %c0_9] : memref<1x1xf32, #tpu.memory_space<vmem>>, vector<1x1xf32>
    tpu.vector_store %arg3[%c0_8, %c0_9], %19 {strides = array<i32>} : memref<1x1xf32, #tpu.memory_space<vmem>>, vector<1x1xf32>,
    return
  }
  func.func @transform_0(%arg0: i32) -> (i32, i32) {
    %c0_i32 = arith.constant 0 : i32
    %c0_i32_0 = arith.constant 0 : i32
    %c0_i32_1 = arith.constant 0 : i32
    return %c0_i32, %c0_i32_0 : i32, i32
  }
  func.func @transform_1(%arg0: i32) -> (i32, i32) {
    %c0_i32 = arith.constant 0 : i32
    %c0_i32_0 = arith.constant 0 : i32
    %c0_i32_1 = arith.constant 0 : i32
    return %c0_i32, %c0_i32_0 : i32, i32
  }
  func.func @transform_2(%arg0: i32) -> (i32, i32) {
    %c0_i32 = arith.constant 0 : i32
    %c0_i32_0 = arith.constant 0 : i32
    %c0_i32_1 = arith.constant 0 : i32
    return %c0_i32, %c0_i32_0 : i32, i32
  }
}

</mosaic_0001>

<bundles_post_ra>
// kernel: video_transformer_forward.3
= control target key start
LH: loop header
LB: loop body
LE: loop exit
PB: predicated region body
PF: predicated region fallthrough
CT: control target
= control target key end

     0   :  { %s357_s0 = inlined_call_operand.vmem [shape: f32[32,32], index: 0, kind: input, shape index: {}]   ;;  %s358_s1 = inlined_call_operand.vmem [shape: f32[32,32], index: 1, kind: output, shape index: {0}]   ;;  %s359_s2 = inlined_call_operand.hbm [shape: f32[1,1], index: 2, kind: output, shape index: {1}]  }
   0x1   :  { %v11_v0 = vld [vmem:[%s357_s0] sm:$0xff]  ;;  %v13_v1 = vld [vmem:[%s357_s0 + $0x10] sm:$0xff]  ;;  %v12_v2 = vld [vmem:[%s357_s0 + $0x8] sm:$0xff] }
   0x2   :  { %v159_v3 = vmul.f32 -1.442695, %v11_v0  ;;  %v161_v4 = vmul.f32 -1.442695, %v13_v1  ;;  %v160_v5 = vmul.f32 -1.442695, %v12_v2 }
   0x3   :  { %v14_v6 = vld [vmem:[%s357_s0 + $0x18] sm:$0xff] }
   0x4   :  { %8 = vsyncpa [#allocation3], 0  ;;  %164 = vpow2.f32 %v159_v3  ;;  %v162_v7 = vmul.f32 -1.442695, %v14_v6  ;;  %v91_v9 = vlaneseq  ;;  %vm106_vm1 = vcmask 261120   ;;  %s206_s24 = smov [#allocation2]  }
   0x5   :  { %166 = vpow2.f32 %v161_v4  ;;  %s148_s27 = sshll.u32 %s359_s2, 4  ;;  %s149_s27 = int_to_ptr.hbm [resolvable:$true] %s148_s27 }
   0x6   :  { %168 = vpow2.f32 %v160_v5  ;;  %v234_v15 = vshrl.u32 %v91_v9, 7  ;;  %v238_v18 = vand.u32 127, %v91_v9 }
   0x7   :  { %170 = vpow2.f32 %v162_v7 }
   0x8   :  { %v241_v19 = vadd.s32 16, %v234_v15  ;;  %v245_v25 = vadd.s32 8, %v234_v15  ;;  %vm98_vm0 = vcmp.eq.s32.totalorder %v234_v15, %v238_v18  ;;  %v252_v28 = vadd.s32 24, %v234_v15 }
   0xa   :  { %v165_v8 = vpop.eup %164  ;;  %vm100_vm2 = vcmp.eq.s32.totalorder %v241_v19, %v238_v18  ;;  %vm99_vm9 = vcmp.eq.s32.totalorder %v245_v25, %v238_v18 }
   0xb   :  { %v167_v10 = vpop.eup %166  ;;  %v27_v11 = vadd.f32 1.0, %v165_v8 }
   0xc   :  { %v169_v12 = vpop.eup %168  ;;  %v29_v13 = vadd.f32 1.0, %v167_v10 }
   0xd   :  { %v171_v14 = vpop.eup %170  ;;  %172 = vrcp.f32 %v27_v11  ;;  %v28_v16 = vadd.f32 1.0, %v169_v12  ;;  %v40_v20 = vand.u32 2147483647, %v27_v11  ;;  %v42_v21 = vand.u32 2147483648, %v27_v11 }
   0xe   :  { %174 = vrcp.f32 %v29_v13  ;;  %v236_v17 = vadd.f32 1.0, %v171_v14  ;;  %v70_v22 = vand.u32 2147483647, %v29_v13  ;;  %v72_v24 = vand.u32 2147483648, %v29_v13 }
   0xf   :  { %176 = vrcp.f32 %v28_v16  ;;  %vm36_vm3 = vweird.f32 %v27_v11  ;;  %vm254_vm4 = vcmp.eq.f32.partialorder %v40_v20, 8.507059e+37  ;;  %vm66_vm5 = vweird.f32 %v29_v13 }
  0x10   :  { %178 = vrcp.f32 %v236_v17  ;;  %v43_v32 = vor.u32 1.1754944e-38, %v42_v21  ;;  %vm258_vm7 = vcmp.eq.f32.partialorder %v70_v22, 8.507059e+37  ;;  %v73_v36 = vor.u32 1.1754944e-38, %v72_v24 }
  0x11   :  { %v55_v37 = vand.u32 2147483647, %v28_v16  ;;  %v57_v41 = vand.u32 2147483648, %v28_v16  ;;  %v85_v42 = vand.u32 2147483647, %v236_v17  ;;  %vm51_vm11 = vweird.f32 %v28_v16 }
  0x12   :  { %v87_v46 = vand.u32 2147483648, %v236_v17  ;;  %vm81_vm14 = vweird.f32 %v236_v17 }
  0x13   :  { %v173_v23 = vpop.eup %172  ;;  %vm279_vm15 = vcmp.eq.f32.partialorder %v55_v37, 8.507059e+37  ;;  %v58_v55 = vor.u32 1.1754944e-38, %v57_v41 }
  0x14   :  { %v175_v26 = vpop.eup %174  ;;  %v32_v27 = vmul.f32 %v173_v23, %v27_v11  ;;  %vm37_vm6 = vweird.f32 %v173_v23  ;;  %v88_v61 = vor.u32 1.1754944e-38, %v87_v46 }
  0x15   :  { %v62_v30 = vmul.f32 %v175_v26, %v29_v13  ;;  %v177_v34 = vpop.eup %176  ;;  %vm67_vm8 = vweird.f32 %v175_v26  ;;  %vm266_vm10 = vmor %vm36_vm3, %vm37_vm6 }
  0x16   :  { %v33_v31 = vsub.f32 1.0, %v32_v27  ;;  %v179_v38 = vpop.eup %178  ;;  %v47_v40 = vmul.f32 %v177_v34, %v28_v16  ;;  %vm274_vm12 = vmor %vm66_vm5, %vm67_vm8  ;;  %vm52_vm13 = vweird.f32 %v177_v34  ;;  %vm285_vm5 = vcmp.eq.f32.partialorder %v85_v42, 8.507059e+37 }
  0x17   :  { %v63_v35 = vsub.f32 1.0, %v62_v30  ;;  %v77_v45 = vmul.f32 %v179_v38, %v236_v17  ;;  %vm82_vm3 = vweird.f32 %v179_v38  ;;  %vm294_vm6 = vmor %vm51_vm11, %vm52_vm13 }
  0x18   :  { %v34_v39 = vmul.f32 %v173_v23, %v33_v31  ;;  %v48_v49 = vsub.f32 1.0, %v47_v40 }
  0x19   :  { %v64_v44 = vmul.f32 %v175_v26, %v63_v35  ;;  %v78_v52 = vsub.f32 1.0, %v77_v45 }
  0x1a   :  { %v35_v47 = vadd.f32 %v173_v23, %v34_v39  ;;  %v49_v54 = vmul.f32 %v177_v34, %v48_v49 }
  0x1b   :  { %v65_v50 = vadd.f32 %v175_v26, %v64_v44  ;;  %v79_v60 = vmul.f32 %v179_v38, %v78_v52 }
  0x1c   :  { %v39_v53 = vsel %vm266_vm10, %v173_v23, %v35_v47  ;;  %v50_v1 = vadd.f32 %v177_v34, %v49_v54 }
  0x1d   :  { %v44_v57 = vsel %vm254_vm4, %v43_v32, %v39_v53  ;;  %v69_v58 = vsel %vm274_vm12, %v175_v26, %v65_v50  ;;  %vm308_vm4 = vmor %vm81_vm14, %vm82_vm3  ;;  %v80_v6 = vadd.f32 %v179_v38, %v79_v60 }
  0x1e   :  { %v111_v62 = vsel %vm98_vm0, 0.0, %v44_v57  ;;  %v102_v63 = vsel %vm98_vm0, 1.0, %v44_v57  ;;  %v74_v0 = vsel %vm258_vm7, %v73_v36, %v69_v58  ;;  %v54_v8 = vsel %vm294_vm6, %v177_v34, %v50_v1 }
  0x1f   :  { %v115_v3 = vsel %vm106_vm1, %v111_v62, 0.0  ;;  %107 = vst.msk [vmem:[%s358_s1] sm:$0xff] %vm106_vm1, %v102_v63  ;;  %v113_v4 = vsel %vm100_vm2, 0.0, %v74_v0  ;;  %v104_v5 = vsel %vm100_vm2, 1.0, %v74_v0  ;;  %vm101_vm0 = vcmp.eq.s32.totalorder %v252_v28, %v238_v18 }
  0x20   :  { %116 = vadd.xlane.f32.xlu0 %v115_v3  ;;  %v121_v7 = vsel %vm106_vm1, %v113_v4, 0.0  ;;  %109 = vst.msk [vmem:[%s358_s1 + $0x10] sm:$0xff] %vm106_vm1, %v104_v5  ;;  %v59_v9 = vsel %vm279_vm15, %v58_v55, %v54_v8  ;;  %v84_v10 = vsel %vm308_vm4, %v179_v38, %v80_v6 }
  0x21   :  { %122 = vadd.xlane.f32.xlu1 %v121_v7  ;;  %v103_v11 = vsel %vm99_vm9, 1.0, %v59_v9  ;;  %v112_v12 = vsel %vm99_vm9, 0.0, %v59_v9  ;;  %v89_v13 = vsel %vm285_vm5, %v88_v61, %v84_v10 }
  0x22   :  { %108 = vst.msk [vmem:[%s358_s1 + $0x8] sm:$0xff] %vm106_vm1, %v103_v11  ;;  %v105_v14 = vsel %vm101_vm0, 1.0, %v89_v13  ;;  %v114_v15 = vsel %vm101_vm0, 0.0, %v89_v13  ;;  %v118_v16 = vsel %vm106_vm1, %v112_v12, 0.0 }
  0x23   :  { %110 = vst.msk [vmem:[%s358_s1 + $0x18] sm:$0xff] %vm106_vm1, %v105_v14  ;;  %v124_v17 = vsel %vm106_vm1, %v114_v15, 0.0  ;;  %s146_s1 = sshll.u32 %s206_s24, 4  ;;  %vm137_vm1 = vcmask 0   ;;  %s147_s1 = int_to_ptr.vmem [resolvable:$true] %s146_s1 }
  0x28   :  { %119 = vadd.xlane.f32.xlu0 %v118_v16 }
  0x29   :  { %125 = vadd.xlane.f32.xlu1 %v124_v17 }
  0x93   :  { %v117_v18 = vpop.xlane.xlu0 %116 }
  0x94   :  { %v123_v19 = vpop.xlane.xlu1 %122 }
  0x9b   :  { %v120_v20 = vpop.xlane.xlu0 %119 }
  0x9c   :  { %v127_v21 = vadd.f32 %v120_v20, %v117_v18  ;;  %v126_v22 = vpop.xlane.xlu1 %125 }
  0x9e   :  { %v128_v23 = vadd.f32 %v127_v21, %v123_v19 }
  0xa0   :  { %v129_v24 = vadd.f32 %v128_v23, %v126_v22 }
  0xa2   :  { %v130_v25 = vrot.slane %v129_v24, 4 }
  0xa4   :  { %v131_v26 = vadd.f32 %v130_v25, %v129_v24 }
  0xa6   :  { %v132_v27 = vrot.slane %v131_v26, 2 }
  0xa8   :  { %v133_v28 = vadd.f32 %v132_v27, %v131_v26 }
  0xaa   :  { %v134_v29 = vrot.slane %v133_v28, 1 }
  0xac   :  { %v135_v30 = vadd.f32 %v134_v29, %v133_v28 }
  0xae   :  { %v136_v31 = vmul.f32 0.0009765625, %v135_v30 }
  0xb0   :  { %138 = vst.msk [vmem:[#allocation2] sm:$0x1] %vm137_vm1, %v136_v31 }
  0xb1   :  { %151 = dma.vmem_to_hbm [thread:$0]  %s147_s1, 16, %s149_s27, [#allocation3]  }
  0xb2   :  { %204 = dma.done.wait [#allocation3], 16  }
  0xb3   :  { %205 = vsyncadd [#allocation3], 4294967280 }
  0xb4   :  { %158 = vsyncpa [#allocation3], 1 }

// kernel: video_transformer_forward.2
= control target key start
LH: loop header
LB: loop body
LE: loop exit
PB: predicated region body
PF: predicated region fallthrough
CT: control target
= control target key end

     0   :  { %vm396_vm0 = vcmask 523264   ;;  %s1465_s2 = inlined_call_operand.vmem [shape: bf16[384,64], index: 2, kind: input, shape index: {}]   ;;  %s1466_s3 = inlined_call_operand.vmem [shape: f32[1,64], index: 3, kind: input, shape index: {}]   ;;  %s1467_s0 = inlined_call_operand.vmem [shape: bf16[64,384], index: 0, kind: input, shape index: {}]   ;;  %s1468_s4 = inlined_call_operand.vmem [shape: f32[1,64], index: 4, kind: input, shape index: {}]   ;;  %s1469_s5 = inlined_call_operand.vmem [shape: f32[1,64], index: 5, kind: input, shape index: {}]   ;;  %s1470_s7 = inlined_call_operand.vmem [shape: f32[1,128], index: 7, kind: input, shape index: {}]   ;;  %s1471_s6 = inlined_call_operand.vmem [shape: bf16[64,128], index: 6, kind: input, shape index: {}]   ;;  %s1472_s8 = inlined_call_operand.vmem [shape: f32[1,128], index: 8, kind: input, shape index: {}]   ;;  %s1473_s1 = inlined_call_operand.vmem [shape: f32[64,1], index: 1, kind: input, shape index: {}]   ;;  %s1474_s9 = inlined_call_operand.vmem [shape: bf16[64,128], index: 9, kind: output, shape index: {}]  }
   0x1   :  { %v972_v0 = vld [vmem:[%s1465_s2 + $0x38] sm:$0xff]  ;;  %v971_v3 = vld [vmem:[%s1465_s2 + $0x30] sm:$0xff]  ;;  %v970_v6 = vld [vmem:[%s1465_s2 + $0x28] sm:$0xff] }
   0x2   :  { %v980_v1 = vld [vmem:[%s1465_s2 + $0x78] sm:$0xff]  ;;  %309 = vmatpush.bf16.msra.mxu0 %v972_v0  ;;  %v979_v4 = vld [vmem:[%s1465_s2 + $0x70] sm:$0xff]  ;;  %v978_v7 = vld [vmem:[%s1465_s2 + $0x68] sm:$0xff] }
   0x3   :  { %v988_v2 = vld [vmem:[%s1465_s2 + $0xb8] sm:$0xff]  ;;  %338 = vmatpush.bf16.msra.mxu1 %v980_v1  ;;  %v987_v5 = vld [vmem:[%s1465_s2 + $0xb0] sm:$0xff]  ;;  %v986_v8 = vld [vmem:[%s1465_s2 + $0xa8] sm:$0xff] }
   0x4   :  { %367 = vmatpush.bf16.msra.mxu2 %v988_v2  ;;  %v969_v9 = vld [vmem:[%s1465_s2 + $0x20] sm:$0xff]  ;;  %v968_v12 = vld [vmem:[%s1465_s2 + $0x18] sm:$0xff]  ;;  %v967_v15 = vld [vmem:[%s1465_s2 + $0x10] sm:$0xff] }
   0x5   :  { %v977_v10 = vld [vmem:[%s1465_s2 + $0x60] sm:$0xff]  ;;  %v976_v13 = vld [vmem:[%s1465_s2 + $0x58] sm:$0xff]  ;;  %v975_v16 = vld [vmem:[%s1465_s2 + $0x50] sm:$0xff] }
   0x6   :  { %310 = vmatpush.bf16.msra.mxu0 %v971_v3  ;;  %v985_v11 = vld [vmem:[%s1465_s2 + $0xa0] sm:$0xff]  ;;  %v984_v14 = vld [vmem:[%s1465_s2 + $0x98] sm:$0xff]  ;;  %v983_v17 = vld [vmem:[%s1465_s2 + $0x90] sm:$0xff] }
   0x7   :  { %339 = vmatpush.bf16.msra.mxu1 %v979_v4  ;;  %v966_v18 = vld [vmem:[%s1465_s2 + $0x8] sm:$0xff]  ;;  %v965_v21 = vld [vmem:[%s1465_s2] sm:$0xff]  ;;  %v793_v26 = vld [vmem:[%s1467_s0 + $0xc] sm:$0xf0] }
   0x8   :  { %368 = vmatpush.bf16.msra.mxu2 %v987_v5  ;;  %v974_v19 = vld [vmem:[%s1465_s2 + $0x48] sm:$0xff]  ;;  %v973_v22 = vld [vmem:[%s1465_s2 + $0x40] sm:$0xff]  ;;  %v955_v29 = vld [vmem:[%s1467_s0 + $0x10] sm:$0xf0] }
   0x9   :  { %v982_v20 = vld [vmem:[%s1465_s2 + $0x88] sm:$0xff]  ;;  %v791_v23 = vld [vmem:[%s1467_s0] sm:$0xf]  ;;  %v953_v25 = vld [vmem:[%s1467_s0 + $0x4] sm:$0xf] }
   0xa   :  { %311 = vmatpush.bf16.msra.mxu0 %v970_v6  ;;  %v954_v24 = vld [vmem:[%s1467_s0 + $0x8] sm:$0xf0]  ;;  %v981_v27 = vld [vmem:[%s1465_s2 + $0x80] sm:$0xff]  ;;  %v799_v28 = vld [vmem:[%s1467_s0 + $0x8] sm:$0xf]  ;;  %v796_v31 = vor.u32 %v953_v25, %v793_v26 }
   0xb   :  { %340 = vmatpush.bf16.msra.mxu1 %v978_v7  ;;  %v792_v30 = vor.u32 %v954_v24, %v791_v23  ;;  %v800_v32 = vor.u32 %v955_v29, %v799_v28  ;;  %v803_v33 = vld [vmem:[%s1467_s0 + $0x18] sm:$0xf]  ;;  %v957_v34 = vld [vmem:[%s1467_s0 + $0x20] sm:$0xf0]  ;;  %v956_v35 = vld [vmem:[%s1467_s0 + $0x1c] sm:$0xf] }
   0xc   :  { %369 = vmatpush.bf16.msra.mxu2 %v986_v8  ;;  %v805_v36 = vld [vmem:[%s1467_s0 + $0x24] sm:$0xf0]  ;;  %v811_v37 = vld [vmem:[%s1467_s0 + $0x20] sm:$0xf]  ;;  %v958_v38 = vld [vmem:[%s1467_s0 + $0x28] sm:$0xf0]  ;;  %v804_v39 = vor.u32 %v957_v34, %v803_v33 }
   0xd   :  { %v808_v40 = vor.u32 %v956_v35, %v805_v36  ;;  %v812_v41 = vor.u32 %v958_v38, %v811_v37  ;;  %v815_v42 = vld [vmem:[%s1467_s0 + $0x30] sm:$0xf]  ;;  %v960_v43 = vld [vmem:[%s1467_s0 + $0x38] sm:$0xf0]  ;;  %v959_v44 = vld [vmem:[%s1467_s0 + $0x34] sm:$0xf] }
   0xe   :  { %312 = vmatpush.bf16.msra.mxu0 %v969_v9  ;;  %v817_v45 = vld [vmem:[%s1467_s0 + $0x3c] sm:$0xf0]  ;;  %v823_v46 = vld [vmem:[%s1467_s0 + $0x38] sm:$0xf]  ;;  %v961_v47 = vld [vmem:[%s1467_s0 + $0x40] sm:$0xf0]  ;;  %v816_v48 = vor.u32 %v960_v43, %v815_v42 }
   0xf   :  { %341 = vmatpush.bf16.msra.mxu1 %v977_v10  ;;  %v820_v49 = vor.u32 %v959_v44, %v817_v45  ;;  %v824_v50 = vor.u32 %v961_v47, %v823_v46  ;;  %v827_v51 = vld [vmem:[%s1467_s0 + $0x48] sm:$0xf]  ;;  %v963_v52 = vld [vmem:[%s1467_s0 + $0x50] sm:$0xf0]  ;;  %v962_v53 = vld [vmem:[%s1467_s0 + $0x4c] sm:$0xf] }
  0x10   :  { %370 = vmatpush.bf16.msra.mxu2 %v985_v11  ;;  %v829_v54 = vld [vmem:[%s1467_s0 + $0x54] sm:$0xf0]  ;;  %v835_v55 = vld [vmem:[%s1467_s0 + $0x50] sm:$0xf]  ;;  %v964_v56 = vld [vmem:[%s1467_s0 + $0x58] sm:$0xf0]  ;;  %v828_v57 = vor.u32 %v963_v52, %v827_v51 }
  0x11   :  { %v832_v58 = vor.u32 %v962_v53, %v829_v54  ;;  %v836_v59 = vor.u32 %v964_v56, %v835_v55  ;;  %v1243_v60 = vld [vmem:[%s1466_s3] ss:$0 sm:$0xff] }
  0x12   :  { %313 = vmatpush.bf16.msra.mxu0 %v968_v12 }
  0x13   :  { %342 = vmatpush.bf16.msra.mxu1 %v976_v13 }
  0x14   :  { %371 = vmatpush.bf16.msra.mxu2 %v984_v14 }
  0x16   :  { %314 = vmatpush.bf16.msra.mxu0 %v967_v15 }
  0x17   :  { %343 = vmatpush.bf16.msra.mxu1 %v975_v16 }
  0x18   :  { %372 = vmatpush.bf16.msra.mxu2 %v983_v17 }
  0x1a   :  { %315 = vmatpush.bf16.msra.mxu0 %v966_v18 }
  0x1b   :  { %344 = vmatpush.bf16.msra.mxu1 %v974_v19 }
  0x1c   :  { %373 = vmatpush.bf16.msra.mxu2 %v982_v20 }
  0x1e   :  { %316 = vmatpush.bf16.msra.mxu0 %v965_v21 }
  0x1f   :  { %345 = vmatpush.bf16.msra.mxu1 %v973_v22 }
  0x20   :  { %374 = vmatpush.bf16.msra.mxu2 %v981_v27 }
  0x21   :  { %317 = vmatmul.bf16.vlgmr.msra.gmra.mxu0 %v792_v30 }
  0x22   :  { %346 = vmatmul.bf16.vlgmr.msra.gmra.mxu1 %v796_v31 }
  0x23   :  { %375 = vmatmul.bf16.vlgmr.msra.gmra.mxu2 %v800_v32 }
  0x31   :  { %322 = vmatmul.bf16.gmra.mxu0 %v804_v39 }
  0x32   :  { %351 = vmatmul.bf16.gmra.mxu1 %v808_v40 }
  0x33   :  { %380 = vmatmul.bf16.gmra.mxu2 %v812_v41 }
  0x41   :  { %327 = vmatmul.bf16.gmra.mxu0 %v816_v48 }
  0x42   :  { %356 = vmatmul.bf16.gmra.mxu1 %v820_v49 }
  0x43   :  { %385 = vmatmul.bf16.gmra.mxu2 %v824_v50 }
  0x51   :  { %332 = vmatmul.bf16.gmra.mxu0 %v828_v57 }
  0x52   :  { %361 = vmatmul.bf16.gmra.mxu1 %v832_v58 }
  0x53   :  { %390 = vmatmul.bf16.gmra.mxu2 %v836_v59 }
  0x9e   :  { %v318_v61 = vpop.f32.mrf.mxu0 }
  0x9f   :  { %v347_v62 = vpop.f32.mrf.mxu1  ;;  %v319_v63 = vadd.f32 %v1243_v60, %v318_v61 }
  0xa1   :  { %v348_v0 = vadd.f32 %v347_v62, %v319_v63 }
  0xa6   :  { %v376_v1 = vpop.f32.mrf.mxu2  ;;  %v320_v3 = vpop.f32.mrf.mxu0 }
  0xa7   :  { %v1246_v2 = vadd.f32 %v376_v1, %v348_v0  ;;  %v349_v4 = vpop.f32.mrf.mxu1  ;;  %v321_v5 = vadd.f32 %v1243_v60, %v320_v3 }
  0xa9   :  { %v397_v6 = vsel %vm396_vm0, %v1246_v2, 0.0  ;;  %v436_v7 = vmul.f32 %v1246_v2, %v1246_v2  ;;  %v350_v9 = vadd.f32 %v349_v4, %v321_v5 }
  0xaa   :  { %398 = vadd.xlane.f32.xlu0 %v397_v6  ;;  %v1044_v6 = vmov 64.0  }
  0xab   :  { %v444_v8 = vsel %vm396_vm0, %v436_v7, 0.0  ;;  %1026 = vrcp.f32 %v1044_v6  ;;  %v1353_v6 = vld [vmem:[%s1468_s4] ss:$0 sm:$0xff] }
  0xac   :  { %445 = vadd.xlane.f32.xlu1 %v444_v8 }
  0xae   :  { %v378_v10 = vpop.f32.mrf.mxu2  ;;  %v323_v12 = vpop.f32.mrf.mxu0 }
  0xaf   :  { %v1254_v11 = vadd.f32 %v378_v10, %v350_v9  ;;  %v352_v13 = vpop.f32.mrf.mxu1  ;;  %v324_v14 = vadd.f32 %v1243_v60, %v323_v12 }
  0xb1   :  { %v400_v15 = vsel %vm396_vm0, %v1254_v11, 0.0  ;;  %v437_v16 = vmul.f32 %v1254_v11, %v1254_v11  ;;  %v353_v17 = vadd.f32 %v352_v13, %v324_v14  ;;  %v1027_v7 = vpop.eup %1026  ;;  %v992_v13 = vld [vmem:[%s1471_s6 + $0x18] sm:$0xff] }
  0xb2   :  { %401 = vadd.xlane.f32.xlu0 %v400_v15  ;;  %v422_v8 = vmul.f32 64.0, %v1027_v7  ;;  %vm426_vm1 = vweird.f32 %v1027_v7  ;;  %732 = vmatpush.bf16.msra.mxu3 %v992_v13  ;;  %v991_v15 = vld [vmem:[%s1471_s6 + $0x10] sm:$0xff] }
  0xb3   :  { %v447_v18 = vsel %vm396_vm0, %v437_v16, 0.0 }
  0xb4   :  { %448 = vadd.xlane.f32.xlu1 %v447_v18  ;;  %v423_v9 = vsub.f32 1.0, %v422_v8 }
  0xb6   :  { %v381_v19 = vpop.f32.mrf.mxu2  ;;  %v325_v21 = vpop.f32.mrf.mxu0  ;;  %v424_v10 = vmul.f32 %v1027_v7, %v423_v9  ;;  %733 = vmatpush.bf16.msra.mxu3 %v991_v15 }
  0xb7   :  { %v1262_v20 = vadd.f32 %v381_v19, %v353_v17  ;;  %v354_v22 = vpop.f32.mrf.mxu1  ;;  %v326_v23 = vadd.f32 %v1243_v60, %v325_v21  ;;  %v990_v19 = vld [vmem:[%s1471_s6 + $0x8] sm:$0xff] }
  0xb8   :  { %v425_v12 = vadd.f32 %v1027_v7, %v424_v10 }
  0xb9   :  { %v403_v24 = vsel %vm396_vm0, %v1262_v20, 0.0  ;;  %v438_v25 = vmul.f32 %v1262_v20, %v1262_v20  ;;  %v355_v27 = vadd.f32 %v354_v22, %v326_v23 }
  0xba   :  { %404 = vadd.xlane.f32.xlu2 %v403_v24  ;;  %v1312_v14 = vsel %vm426_vm1, %v1027_v7, %v425_v12  ;;  %734 = vmatpush.bf16.msra.mxu3 %v990_v19  ;;  %v989_v24 = vld [vmem:[%s1471_s6] sm:$0xff] }
  0xbb   :  { %v450_v26 = vsel %vm396_vm0, %v438_v25, 0.0 }
  0xbc   :  { %451 = vadd.xlane.f32.xlu0 %v450_v26 }
  0xbe   :  { %v383_v28 = vpop.f32.mrf.mxu2  ;;  %v328_v30 = vpop.f32.mrf.mxu0  ;;  %735 = vmatpush.bf16.msra.mxu3 %v989_v24 }
  0xbf   :  { %v1270_v29 = vadd.f32 %v383_v28, %v355_v27  ;;  %v357_v31 = vpop.f32.mrf.mxu1  ;;  %v329_v32 = vadd.f32 %v1243_v60, %v328_v30 }
  0xc1   :  { %v406_v33 = vsel %vm396_vm0, %v1270_v29, 0.0  ;;  %v439_v34 = vmul.f32 %v1270_v29, %v1270_v29  ;;  %v358_v35 = vadd.f32 %v357_v31, %v329_v32 }
  0xc2   :  { %407 = vadd.xlane.f32.xlu2 %v406_v33 }
  0xc3   :  { %v453_v36 = vsel %vm396_vm0, %v439_v34, 0.0 }
  0xc4   :  { %454 = vadd.xlane.f32.xlu1 %v453_v36 }
  0xc6   :  { %v386_v37 = vpop.f32.mrf.mxu2  ;;  %v330_v39 = vpop.f32.mrf.mxu0 }
  0xc7   :  { %v1278_v38 = vadd.f32 %v386_v37, %v358_v35  ;;  %v359_v40 = vpop.f32.mrf.mxu1  ;;  %v331_v41 = vadd.f32 %v1243_v60, %v330_v39 }
  0xc9   :  { %v409_v42 = vsel %vm396_vm0, %v1278_v38, 0.0  ;;  %v440_v43 = vmul.f32 %v1278_v38, %v1278_v38  ;;  %v360_v45 = vadd.f32 %v359_v40, %v331_v41 }
  0xca   :  { %410 = vadd.xlane.f32.xlu2 %v409_v42 }
  0xcb   :  { %v456_v44 = vsel %vm396_vm0, %v440_v43, 0.0 }
  0xcc   :  { %457 = vadd.xlane.f32.xlu1 %v456_v44 }
  0xce   :  { %v388_v46 = vpop.f32.mrf.mxu2  ;;  %v333_v48 = vpop.f32.mrf.mxu0 }
  0xcf   :  { %v1286_v47 = vadd.f32 %v388_v46, %v360_v45  ;;  %v334_v49 = vadd.f32 %v1243_v60, %v333_v48  ;;  %v362_v52 = vpop.f32.mrf.mxu1 }
  0xd1   :  { %v412_v50 = vsel %vm396_vm0, %v1286_v47, 0.0  ;;  %v441_v51 = vmul.f32 %v1286_v47, %v1286_v47  ;;  %v363_v53 = vadd.f32 %v362_v52, %v334_v49 }
  0xd2   :  { %413 = vadd.xlane.f32.xlu0 %v412_v50 }
  0xd3   :  { %v459_v54 = vsel %vm396_vm0, %v441_v51, 0.0 }
  0xd4   :  { %460 = vadd.xlane.f32.xlu2 %v459_v54  ;;  %v632_v54 = vld [vmem:[%s1473_s1] sm:$0xff] }
  0xd6   :  { %v391_v55 = vpop.f32.mrf.mxu2  ;;  %v335_v57 = vpop.f32.mrf.mxu0 }
  0xd7   :  { %v1294_v56 = vadd.f32 %v391_v55, %v363_v53  ;;  %v336_v58 = vadd.f32 %v1243_v60, %v335_v57  ;;  %v364_v63 = vpop.f32.mrf.mxu1  ;;  %v1045_v53 = vmov 0  }
  0xd8   :  { %1018 = vset.pattern.permute.xlu1 %v1045_v53  ;;  %1020 = vset.pattern.permute.xlu0 %v1045_v53 }
  0xd9   :  { %v415_v59 = vsel %vm396_vm0, %v1294_v56, 0.0  ;;  %v442_v61 = vmul.f32 %v1294_v56, %v1294_v56  ;;  %v365_v0 = vadd.f32 %v364_v63, %v336_v58  ;;  %1019 = vset.pattern.permute.xlu2 %v1045_v53 }
  0xda   :  { %416 = vadd.xlane.f32.xlu0 %v415_v59 }
  0xdb   :  { %v462_v62 = vsel %vm396_vm0, %v442_v61, 0.0 }
  0xdc   :  { %463 = vadd.xlane.f32.xlu2 %v462_v62 }
  0xde   :  { %v393_v1 = vpop.f32.mrf.mxu2 }
  0xdf   :  { %v1302_v3 = vadd.f32 %v393_v1, %v365_v0 }
  0xe1   :  { %v418_v4 = vsel %vm396_vm0, %v1302_v3, 0.0  ;;  %v443_v60 = vmul.f32 %v1302_v3, %v1302_v3 }
  0xe2   :  { %419 = vadd.xlane.f32.xlu1 %v418_v4 }
  0xe3   :  { %v465_v5 = vsel %vm396_vm0, %v443_v60, 0.0 }
  0xe4   :  { %466 = vadd.xlane.f32.xlu0 %v465_v5 }
  0xfb   :  { %643 = vperm.xlu1 %1018, %v632_v54  }
 0x11d   :  { %v399_v16 = vpop.xlane.xlu0 %398 }
 0x11e   :  { %v428_v17 = vmul.f32 %v1312_v14, %v399_v16 }
 0x11f   :  { %v446_v18 = vpop.xlane.xlu1 %445 }
 0x120   :  { %v476_v21 = vmul.f32 %v428_v17, %v428_v17  ;;  %v468_v22 = vmul.f32 %v446_v18, %v1312_v14  ;;  %v492_v63 = vsub.f32 %v1246_v2, %v428_v17 }
 0x122   :  { %v484_v23 = vsub.f32 %v468_v22, %v476_v21 }
 0x124   :  { %v500_v25 = vadd.f32 1e-05, %v484_v23 }
 0x125   :  { %v402_v26 = vpop.xlane.xlu0 %401 }
 0x126   :  { %1028 = vrsqrt.f32 %v500_v25  ;;  %v1326_v27 = vmul.f32 %v1312_v14, %v402_v26  ;;  %vm514_vm3 = vweird.f32 %v500_v25 }
 0x127   :  { %v449_v28 = vpop.xlane.xlu1 %448 }
 0x128   :  { %v477_v30 = vmul.f32 %v1326_v27, %v1326_v27  ;;  %v469_v31 = vmul.f32 %v449_v28, %v1312_v14  ;;  %v493_v10 = vsub.f32 %v1254_v11, %v1326_v27  ;;  %v1368_v11 = vld [vmem:[%s1469_s5] ss:$0 sm:$0xff] }
 0x12a   :  { %v485_v32 = vsub.f32 %v469_v31, %v477_v30 }
 0x12c   :  { %v1029_v33 = vpop.eup %1028  ;;  %v501_v34 = vadd.f32 1e-05, %v485_v32 }
 0x12d   :  { %v509_v35 = vmul.f32 %v1029_v33, %v500_v25  ;;  %v405_v36 = vpop.xlane.xlu2 %404  ;;  %vm515_vm2 = vweird.f32 %v1029_v33 }
 0x12e   :  { %1030 = vrsqrt.f32 %v501_v34  ;;  %v1332_v37 = vmul.f32 %v1312_v14, %v405_v36  ;;  %vm516_vm4 = vmor %vm514_vm3, %vm515_vm2  ;;  %vm524_vm6 = vweird.f32 %v501_v34 }
 0x12f   :  { %v510_v39 = vmul.f32 %v1029_v33, %v509_v35  ;;  %v452_v40 = vpop.xlane.xlu0 %451  ;;  %v634_v35 = vld [vmem:[%s1473_s1 + $0x10] sm:$0xff] }
 0x130   :  { %v478_v41 = vmul.f32 %v1332_v37, %v1332_v37  ;;  %v470_v42 = vmul.f32 %v452_v40, %v1312_v14  ;;  %653 = vperm.xlu0 %1020, %v634_v35  }
 0x131   :  { %v511_v43 = vmul.f32 0.5, %v510_v39 }
 0x132   :  { %v486_v44 = vsub.f32 %v470_v42, %v478_v41 }
 0x133   :  { %v512_v45 = vsub.f32 1.5, %v511_v43 }
 0x134   :  { %v1031_v46 = vpop.eup %1030  ;;  %v1337_v48 = vadd.f32 1e-05, %v486_v44  ;;  %v494_v44 = vsub.f32 %v1262_v20, %v1332_v37 }
 0x135   :  { %v513_v49 = vmul.f32 %v1029_v33, %v512_v45  ;;  %v519_v50 = vmul.f32 %v1031_v46, %v501_v34  ;;  %v408_v51 = vpop.xlane.xlu2 %407  ;;  %vm525_vm5 = vweird.f32 %v1031_v46 }
 0x136   :  { %1032 = vrsqrt.f32 %v1337_v48  ;;  %v1341_v52 = vmul.f32 %v1312_v14, %v408_v51  ;;  %vm526_vm7 = vmor %vm524_vm6, %vm525_vm5  ;;  %vm534_vm9 = vweird.f32 %v1337_v48 }
 0x137   :  { %v520_v55 = vmul.f32 %v1031_v46, %v519_v50  ;;  %v455_v57 = vpop.xlane.xlu1 %454  ;;  %v517_v61 = vsel %vm516_vm4, %v1029_v33, %v513_v49 }
 0x138   :  { %v479_v58 = vmul.f32 %v1341_v52, %v1341_v52  ;;  %v471_v59 = vmul.f32 %v455_v57, %v1312_v14  ;;  %v588_v5 = vmul.f32 %v517_v61, %v492_v63  ;;  %v636_v61 = vld [vmem:[%s1473_s1 + $0x20] sm:$0xff] }
 0x139   :  { %v521_v62 = vmul.f32 0.5, %v520_v55  ;;  %v495_v55 = vsub.f32 %v1270_v29, %v1341_v52  ;;  %663 = vperm.xlu1 %1018, %v636_v61  }
 0x13a   :  { %v487_v0 = vsub.f32 %v471_v59, %v479_v58  ;;  %v600_v19 = vmul.f32 %v1353_v6, %v588_v5  ;;  %v633_v59 = vld [vmem:[%s1473_s1 + $0x8] sm:$0xff] }
 0x13b   :  { %v522_v1 = vsub.f32 1.5, %v521_v62  ;;  %648 = vperm.xlu2 %1019, %v633_v59  }
 0x13c   :  { %v1033_v4 = vpop.eup %1032  ;;  %v503_v60 = vadd.f32 1e-05, %v487_v0  ;;  %v612_v27 = vadd.f32 %v1368_v11, %v600_v19 }
 0x13d   :  { %v523_v7 = vmul.f32 %v1031_v46, %v522_v1  ;;  %v529_v8 = vmul.f32 %v1033_v4, %v1337_v48  ;;  %v411_v9 = vpop.xlane.xlu2 %410  ;;  %vm535_vm8 = vweird.f32 %v1033_v4 }
 0x13e   :  { %1034 = vrsqrt.f32 %v503_v60  ;;  %v1359_v2 = vmul.f32 %v1312_v14, %v411_v9  ;;  %vm536_vm10 = vmor %vm534_vm9, %vm535_vm8  ;;  %vm544_vm12 = vweird.f32 %v503_v60 }
 0x13f   :  { %v527_v12 = vsel %vm526_vm7, %v1031_v46, %v523_v7  ;;  %v530_v13 = vmul.f32 %v1033_v4, %v529_v8  ;;  %v458_v15 = vpop.xlane.xlu1 %457 }
 0x140   :  { %v480_v16 = vmul.f32 %v1359_v2, %v1359_v2  ;;  %v472_v17 = vmul.f32 %v458_v15, %v1312_v14  ;;  %v589_v18 = vmul.f32 %v527_v12, %v493_v10 }
 0x141   :  { %v531_v21 = vmul.f32 0.5, %v530_v13 }
 0x142   :  { %v488_v22 = vsub.f32 %v472_v17, %v480_v16  ;;  %v601_v23 = vmul.f32 %v1353_v6, %v589_v18 }
 0x143   :  { %v532_v24 = vsub.f32 1.5, %v531_v21 }
 0x144   :  { %v1035_v25 = vpop.eup %1034  ;;  %v1371_v26 = vadd.f32 1e-05, %v488_v22  ;;  %v613_v28 = vadd.f32 %v1368_v11, %v601_v23  ;;  %v635_v23 = vld [vmem:[%s1473_s1 + $0x18] sm:$0xff] }
 0x145   :  { %v533_v30 = vmul.f32 %v1033_v4, %v532_v24  ;;  %v539_v31 = vmul.f32 %v1035_v25, %v503_v60  ;;  %v414_v32 = vpop.xlane.xlu0 %413  ;;  %vm545_vm11 = vweird.f32 %v1035_v25  ;;  %v638_v24 = vld [vmem:[%s1473_s1 + $0x30] sm:$0xff]  ;;  %658 = vperm.xlu2 %1019, %v635_v23  }
 0x146   :  { %1036 = vrsqrt.f32 %v1371_v26  ;;  %v1377_v33 = vmul.f32 %v1312_v14, %v414_v32  ;;  %v620_v34 = vpack.c.bf16 %v613_v28, %v612_v27  ;;  %vm546_vm13 = vmor %vm544_vm12, %vm545_vm11  ;;  %vm554_vm15 = vweird.f32 %v1371_v26  ;;  %673 = vperm.xlu1 %1018, %v638_v24  }
 0x147   :  { %v540_v36 = vmul.f32 %v1035_v25, %v539_v31  ;;  %v461_v39 = vpop.xlane.xlu2 %460  ;;  %v537_v42 = vsel %vm536_vm10, %v1033_v4, %v533_v30  ;;  %v496_v27 = vsub.f32 %v1278_v38, %v1359_v2 }
 0x148   :  { %v481_v40 = vmul.f32 %v1377_v33, %v1377_v33  ;;  %v473_v41 = vmul.f32 %v461_v39, %v1312_v14  ;;  %949 = vmatmul.msk.bf16.vlgmr.msra.gmra.mxu3 %vm396_vm0, %v620_v34  ;;  %v590_v50 = vmul.f32 %v537_v42, %v494_v44  ;;  %v637_v39 = vld [vmem:[%s1473_s1 + $0x28] sm:$0xff] }
 0x149   :  { %v541_v43 = vmul.f32 0.5, %v540_v36  ;;  %v497_v36 = vsub.f32 %v1286_v47, %v1377_v33 }
 0x14a   :  { %v489_v45 = vsub.f32 %v473_v41, %v481_v40  ;;  %v602_v63 = vmul.f32 %v1353_v6, %v590_v50  ;;  %v639_v50 = vld [vmem:[%s1473_s1 + $0x38] sm:$0xff] }
 0x14b   :  { %v542_v46 = vsub.f32 1.5, %v541_v43 }
 0x14c   :  { %v1037_v48 = vpop.eup %1036  ;;  %v505_v49 = vadd.f32 1e-05, %v489_v45  ;;  %v614_v8 = vadd.f32 %v1368_v11, %v602_v63 }
 0x14d   :  { %v543_v51 = vmul.f32 %v1035_v25, %v542_v46  ;;  %v549_v53 = vmul.f32 %v1037_v48, %v1371_v26  ;;  %v417_v54 = vpop.xlane.xlu0 %416  ;;  %vm555_vm14 = vweird.f32 %v1037_v48  ;;  %668 = vperm.xlu2 %1019, %v637_v39  }
 0x14e   :  { %1038 = vrsqrt.f32 %v505_v49  ;;  %v1393_v57 = vmul.f32 %v1312_v14, %v417_v54  ;;  %vm1410_vm1 = vmor %vm554_vm15, %vm555_vm14  ;;  %vm564_vm3 = vweird.f32 %v505_v49 }
 0x14f   :  { %v547_v20 = vsel %vm546_vm13, %v1035_v25, %v543_v51  ;;  %v550_v37 = vmul.f32 %v1037_v48, %v549_v53  ;;  %v464_v58 = vpop.xlane.xlu2 %463 }
 0x150   :  { %v482_v62 = vmul.f32 %v1393_v57, %v1393_v57  ;;  %v474_v29 = vmul.f32 %v464_v58, %v1312_v14  ;;  %v591_v52 = vmul.f32 %v547_v20, %v495_v55  ;;  %v498_v55 = vsub.f32 %v1294_v56, %v1393_v57  ;;  %v1024_v56 = vld [vmem:[%s1470_s7] ss:$0 sm:$0xff] }
 0x151   :  { %v551_v0 = vmul.f32 0.5, %v550_v37 }
 0x152   :  { %v490_v1 = vsub.f32 %v474_v29, %v482_v62  ;;  %v603_v4 = vmul.f32 %v1353_v6, %v591_v52 }
 0x153   :  { %v552_v60 = vsub.f32 1.5, %v551_v0 }
 0x154   :  { %v1039_v5 = vpop.eup %1038  ;;  %v506_v7 = vadd.f32 1e-05, %v490_v1  ;;  %v615_v9 = vadd.f32 %v1368_v11, %v603_v4 }
 0x155   :  { %v553_v10 = vmul.f32 %v1037_v48, %v552_v60  ;;  %v559_v12 = vmul.f32 %v1039_v5, %v505_v49  ;;  %v420_v13 = vpop.xlane.xlu1 %419  ;;  %vm565_vm2 = vweird.f32 %v1039_v5  ;;  %678 = vperm.xlu2 %1019, %v639_v50  }
 0x156   :  { %1040 = vrsqrt.f32 %v506_v7  ;;  %v435_v15 = vmul.f32 %v1312_v14, %v420_v13  ;;  %v621_v16 = vpack.c.bf16 %v615_v9, %v614_v8  ;;  %vm566_vm4 = vmor %vm564_vm3, %vm565_vm2  ;;  %vm574_vm6 = vweird.f32 %v506_v7 }
 0x157   :  { %v560_v17 = vmul.f32 %v1039_v5, %v559_v12  ;;  %v467_v18 = vpop.xlane.xlu0 %466  ;;  %v557_v25 = vsel %vm1410_vm1, %v1037_v48, %v553_v10 }
 0x158   :  { %v483_v21 = vmul.f32 %v435_v15, %v435_v15  ;;  %v475_v22 = vmul.f32 %v467_v18, %v1312_v14  ;;  %950 = vmatmul.msk.bf16.gmra.mxu3 %vm396_vm0, %v621_v16  ;;  %v592_v32 = vmul.f32 %v557_v25, %v496_v27  ;;  %v499_v59 = vsub.f32 %v1302_v3, %v435_v15 }
 0x159   :  { %v561_v26 = vmul.f32 0.5, %v560_v17 }
 0x15a   :  { %v491_v14 = vsub.f32 %v475_v22, %v483_v21  ;;  %v604_v41 = vmul.f32 %v1353_v6, %v592_v32 }
 0x15b   :  { %v562_v28 = vsub.f32 1.5, %v561_v26 }
 0x15c   :  { %v1041_v30 = vpop.eup %1040  ;;  %v507_v31 = vadd.f32 1e-05, %v491_v14  ;;  %v616_v46 = vadd.f32 %v1368_v11, %v604_v41 }
 0x15d   :  { %v563_v34 = vmul.f32 %v1039_v5, %v562_v28  ;;  %v569_v35 = vmul.f32 %v1041_v30, %v506_v7  ;;  %vm575_vm5 = vweird.f32 %v1041_v30 }
 0x15e   :  { %1042 = vrsqrt.f32 %v507_v31  ;;  %vm576_vm7 = vmor %vm574_vm6, %vm575_vm5  ;;  %vm584_vm9 = vweird.f32 %v507_v31 }
 0x15f   :  { %v567_v40 = vsel %vm566_vm4, %v1039_v5, %v563_v34  ;;  %v570_v38 = vmul.f32 %v1041_v30, %v569_v35 }
 0x160   :  { %v593_v2 = vmul.f32 %v567_v40, %v497_v36 }
 0x161   :  { %v571_v42 = vmul.f32 0.5, %v570_v38 }
 0x162   :  { %v605_v43 = vmul.f32 %v1353_v6, %v593_v2 }
 0x163   :  { %v572_v44 = vsub.f32 1.5, %v571_v42 }
 0x164   :  { %v1043_v45 = vpop.eup %1042  ;;  %v617_v47 = vadd.f32 %v1368_v11, %v605_v43 }
 0x165   :  { %v573_v33 = vmul.f32 %v1041_v30, %v572_v44  ;;  %v579_v48 = vmul.f32 %v1043_v45, %v507_v31  ;;  %vm585_vm8 = vweird.f32 %v1043_v45 }
 0x166   :  { %v622_v49 = vpack.c.bf16 %v617_v47, %v616_v46  ;;  %vm586_vm10 = vmor %vm584_vm9, %vm585_vm8 }
 0x167   :  { %v580_v51 = vmul.f32 %v1043_v45, %v579_v48  ;;  %v577_v53 = vsel %vm576_vm7, %v1041_v30, %v573_v33 }
 0x168   :  { %951 = vmatmul.msk.bf16.gmra.mxu3 %vm396_vm0, %v622_v49  ;;  %v594_v37 = vmul.f32 %v577_v53, %v498_v55 }
 0x169   :  { %v581_v54 = vmul.f32 0.5, %v580_v51 }
 0x16a   :  { %v606_v29 = vmul.f32 %v1353_v6, %v594_v37 }
 0x16b   :  { %v582_v20 = vsub.f32 1.5, %v581_v54 }
 0x16c   :  { %v618_v63 = vadd.f32 %v1368_v11, %v606_v29 }
 0x16d   :  { %v583_v58 = vmul.f32 %v1043_v45, %v582_v20  ;;  %v644_v57 = vpop.permute.xlu1 %643 }
 0x16e   :  { %v684_v60 = vmul.f32 %v1024_v56, %v644_v57 }
 0x16f   :  { %v587_v61 = vsel %vm586_vm10, %v1043_v45, %v583_v58 }
 0x170   :  { %v595_v62 = vmul.f32 %v587_v61, %v499_v59 }
 0x172   :  { %v607_v52 = vmul.f32 %v1353_v6, %v595_v62  ;;  %v1025_v6 = vld [vmem:[%s1472_s8] ss:$0 sm:$0xff] }
 0x174   :  { %v619_v0 = vadd.f32 %v1368_v11, %v607_v52 }
 0x176   :  { %v623_v1 = vpack.c.bf16 %v619_v0, %v618_v63 }
 0x178   :  { %952 = vmatmul.msk.bf16.gmra.mxu3 %vm396_vm0, %v623_v1 }
 0x195   :  { %v649_v4 = vpop.permute.xlu2 %648 }
 0x196   :  { %v685_v5 = vmul.f32 %v1024_v56, %v649_v4 }
 0x19f   :  { %v659_v17 = vpop.permute.xlu2 %658 }
 0x1a0   :  { %v687_v18 = vmul.f32 %v1024_v56, %v659_v17 }
 0x1a2   :  { %v654_v13 = vpop.permute.xlu0 %653 }
 0x1a3   :  { %v686_v16 = vmul.f32 %v1024_v56, %v654_v13 }
 0x1a7   :  { %v669_v28 = vpop.permute.xlu2 %668 }
 0x1a8   :  { %v689_v30 = vmul.f32 %v1024_v56, %v669_v28 }
 0x1ab   :  { %v664_v26 = vpop.permute.xlu1 %663 }
 0x1ac   :  { %v688_v14 = vmul.f32 %v1024_v56, %v664_v26 }
 0x1af   :  { %v679_v2 = vpop.permute.xlu2 %678 }
 0x1b0   :  { %v691_v42 = vmul.f32 %v1024_v56, %v679_v2 }
 0x1b8   :  { %v674_v38 = vpop.permute.xlu1 %673 }
 0x1b9   :  { %v690_v41 = vmul.f32 %v1024_v56, %v674_v38 }
 0x1cb   :  { %v737_v3 = vpop.f32.mrf.mxu3 }
 0x1cc   :  { %v738_v7 = vadd.f32 %v737_v3, %v684_v60 }
 0x1ce   :  { %v761_v11 = vadd.f32 %v1025_v6, %v738_v7 }
 0x1d3   :  { %v739_v8 = vpop.f32.mrf.mxu3 }
 0x1d4   :  { %v740_v9 = vadd.f32 %v739_v8, %v685_v5 }
 0x1d6   :  { %v762_v10 = vadd.f32 %v1025_v6, %v740_v9 }
 0x1d8   :  { %v996_v12 = vpack.c.bf16 %v762_v10, %v761_v11 }
 0x1da   :  { %997 = vst [vmem:[%s1474_s9] sm:$0xff] %v996_v12  }
 0x1db   :  { %v742_v15 = vpop.f32.mrf.mxu3 }
 0x1dc   :  { %v743_v19 = vadd.f32 %v742_v15, %v686_v16 }
 0x1de   :  { %v763_v23 = vadd.f32 %v1025_v6, %v743_v19 }
 0x1e3   :  { %v744_v21 = vpop.f32.mrf.mxu3 }
 0x1e4   :  { %v745_v22 = vadd.f32 %v744_v21, %v687_v18 }
 0x1e6   :  { %v764_v24 = vadd.f32 %v1025_v6, %v745_v22 }
 0x1e8   :  { %v1001_v25 = vpack.c.bf16 %v764_v24, %v763_v23 }
 0x1ea   :  { %1013 = vst [vmem:[%s1474_s9 + $0x8] sm:$0xff] %v1001_v25  }
 0x1eb   :  { %v747_v27 = vpop.f32.mrf.mxu3 }
 0x1ec   :  { %v748_v31 = vadd.f32 %v747_v27, %v688_v14 }
 0x1ee   :  { %v765_v35 = vadd.f32 %v1025_v6, %v748_v31 }
 0x1f3   :  { %v749_v32 = vpop.f32.mrf.mxu3 }
 0x1f4   :  { %v750_v34 = vadd.f32 %v749_v32, %v689_v30 }
 0x1f6   :  { %v766_v36 = vadd.f32 %v1025_v6, %v750_v34 }
 0x1f8   :  { %v1006_v39 = vpack.c.bf16 %v766_v36, %v765_v35 }
 0x1fa   :  { %1014 = vst [vmem:[%s1474_s9 + $0x10] sm:$0xff] %v1006_v39  }
 0x1fb   :  { %v752_v40 = vpop.f32.mrf.mxu3 }
 0x1fc   :  { %v753_v43 = vadd.f32 %v752_v40, %v690_v41 }
 0x1fe   :  { %v767_v46 = vadd.f32 %v1025_v6, %v753_v43 }
 0x203   :  { %v754_v44 = vpop.f32.mrf.mxu3 }
 0x204   :  { %v755_v45 = vadd.f32 %v754_v44, %v691_v42 }
 0x206   :  { %v768_v47 = vadd.f32 %v1025_v6, %v755_v45 }
 0x208   :  { %v1011_v33 = vpack.c.bf16 %v768_v47, %v767_v46 }
 0x20a   :  { %1015 = vst [vmem:[%s1474_s9 + $0x18] sm:$0xff] %v1011_v33  }

</bundles_post_ra>
